<compile_context>
chip_gen: v6e
topology: v6e:2x2x1
jax: 0.10.0
libtpu: 0.0.40
codegen_flags: <defaults>
</compile_context>

<pallas_src>
import functools

import jax
import jax.numpy as jnp
from jax.experimental import pallas as pl
from jax.experimental.pallas import tpu as pltpu


def _round_up(a, b):
    return (a + b - 1) // b * b


def _label_agree_kernel(idx_ref, x_hbm, out_ref, xr_buf, xc_buf, sem, *,
                        block_e, n_edges):
    """One grid step gathers and scores a block of `block_e` edges.

    idx_ref : SMEM  int32[grid*2*BE]   flat [rows_blk | cols_blk] per block
    x_hbm   : ANY   x[(N, D)]          node features, never copied wholesale
    out_ref : VMEM  f32[(1, 1, BE)]    sigmoid(<x[row], x[col]>), lane-dense
    xr_buf  : VMEM  x.dtype[(BE, D)]   gathered x[row]
    xc_buf  : VMEM  x.dtype[(BE, D)]   gathered x[col]
    sem     : DMA semaphores, shape (2,)
    """
    i = pl.program_id(0)
    base = i * (2 * block_e)
    # Number of real (non-padded) edges in this block.  Padded lanes of the
    # output are sliced off by the wrapper, so their buffer rows may hold
    # stale garbage without affecting results.
    ec = jnp.minimum(block_e, n_edges - i * block_e)

    def issue(e, carry):
        r = idx_ref[base + e]
        c = idx_ref[base + block_e + e]
        pltpu.make_async_copy(x_hbm.at[pl.ds(r, 1), :],
                              xr_buf.at[pl.ds(e, 1), :], sem.at[0]).start()
        pltpu.make_async_copy(x_hbm.at[pl.ds(c, 1), :],
                              xc_buf.at[pl.ds(e, 1), :], sem.at[1]).start()
        return carry

    jax.lax.fori_loop(0, ec, issue, 0)

    def drain(e, carry):
        # Every gather copy has the identical (1, D) shape, so waiting with a
        # same-shaped descriptor on the shared semaphore matches exactly.
        pltpu.make_async_copy(x_hbm.at[pl.ds(0, 1), :],
                              xr_buf.at[pl.ds(0, 1), :], sem.at[0]).wait()
        pltpu.make_async_copy(x_hbm.at[pl.ds(0, 1), :],
                              xc_buf.at[pl.ds(0, 1), :], sem.at[1]).wait()
        return carry

    jax.lax.fori_loop(0, ec, drain, 0)

    # Full-precision edge dot products; lane-dense (1, 1, BE) output store.
    xr = xr_buf[...].astype(jnp.float32)                 # (BE, D)
    xc = xc_buf[...].astype(jnp.float32)                 # (BE, D)
    dots = jnp.sum(xr * xc, axis=1)                      # (BE,) f32
    prob = jax.nn.sigmoid(dots)
    out_ref[...] = prob.reshape(out_ref.shape).astype(out_ref.dtype)


@functools.partial(jax.jit, static_argnames=("block_e",))
def label_agree_pred(x, edge_index, block_e=512):
    """Pallas implementation of Label_Agree_Pred.forward(x, edge_index)."""
    n_nodes, d = x.shape
    n_edges = edge_index.shape[1]

    row = edge_index[0].astype(jnp.int32)
    col = edge_index[1].astype(jnp.int32)

    # Edge-block size: lane-dense multiple of 128, capped at the padded edge
    # count (no point in blocks larger than the whole edge list).
    be = max(128, _round_up(min(int(block_e), _round_up(n_edges, 128)), 128))
    e_pad = _round_up(n_edges, be)
    grid_n = e_pad // be
    pad = e_pad - n_edges
    # Pad with node 0; padded edges are skipped in the kernel (loop bound `ec`)
    # and their outputs are sliced off below.
    row_p = jnp.pad(row, (0, pad))
    col_p = jnp.pad(col, (0, pad))

    # Flat SMEM-prefetched index layout, per block g: [rows_g | cols_g].
    idx = jnp.concatenate(
        [row_p.reshape(grid_n, 1, be), col_p.reshape(grid_n, 1, be)],
        axis=1).reshape(grid_n * 2 * be)

    # VMEM: only the two (BE, D) gather buffers + the double-buffered output
    # block remain; clamp the requested limit to physical capacity (v7x has
    # only 64 MiB per TensorCore).
    itemsize = jnp.dtype(x.dtype).itemsize
    kernel_vmem = 2 * be * d * itemsize + 2 * be * 4 + (1 << 20)
    try:
        phys = pltpu.get_tpu_info().vmem_capacity_bytes
    except Exception:
        phys = 64 << 20
    vmem_limit = int(min(phys - (8 << 20), max(32 << 20, 2 * kernel_vmem)))

    out = pl.pallas_call(
        functools.partial(_label_agree_kernel, block_e=be, n_edges=n_edges),
        out_shape=jax.ShapeDtypeStruct((grid_n, 1, be), jnp.float32),
        grid_spec=pltpu.PrefetchScalarGridSpec(
            num_scalar_prefetch=1,                        # idx -> SMEM
            grid=(grid_n,),
            in_specs=[pl.BlockSpec(memory_space=pl.ANY)],  # x stays in HBM
            out_specs=pl.BlockSpec((1, 1, be), lambda i, idx_sref: (i, 0, 0)),
            scratch_shapes=[
                pltpu.VMEM((be, d), x.dtype),              # gathered x[row]
                pltpu.VMEM((be, d), x.dtype),              # gathered x[col]
                pltpu.SemaphoreType.DMA((2,)),
            ],
        ),
        compiler_params=pltpu.CompilerParams(
            dimension_semantics=("parallel",),             # v7x: 2 TC sharding
            vmem_limit_bytes=vmem_limit),
    )(idx, x)

    return out.reshape(e_pad)[:n_edges]


def _reference(x, edge_index):
    row, col = edge_index[0], edge_index[1]
    return jax.nn.sigmoid(jnp.sum(x[row] * x[col], axis=1))


if __name__ == "__main__":
    key = jax.random.PRNGKey(0)
    k_x, k_row, k_col = jax.random.split(key, 3)

    # Small graph: 16 nodes, 32-dim features, 200 edges (exercises a 2-step
    # grid with a partially filled last block when block_e=128).
    N, D, E = 16, 32, 200

    x = jax.random.normal(k_x, (N, D), dtype=jnp.float32)
    row = jax.random.randint(k_row, (E,), 0, N, dtype=jnp.int32)
    col = jax.random.randint(k_col, (E,), 0, N, dtype=jnp.int32)
    edge_index = jnp.stack([row, col], axis=0)   # [2, E]

    prob = jax.block_until_ready(label_agree_pred(x, edge_index, block_e=128))
    assert prob.shape == (E,)

    # Full-f32 reference: the DMA gather is bit-exact, so only f32 summation
    # order / sigmoid rounding can differ.
    ref = _reference(x, edge_index)
    assert jnp.allclose(prob, ref, atol=1e-4, rtol=1e-4), (prob, ref)

    print("KERNEL_OK")
</pallas_src>

<mosaic_0001>
module attributes {stable_mosaic.version = 11 : i64} {
  func.func @_label_agree_kernel(%arg0: i32, %arg1: memref<512xi32, #tpu.memory_space<smem>>, %arg2: memref<16x32xf32, #tpu.memory_space<any>>, %arg3: memref<1x1x128xf32, #tpu.memory_space<vmem>>, %arg4: memref<128x32xf32, #tpu.memory_space<vmem>>, %arg5: memref<128x32xf32, #tpu.memory_space<vmem>>, %arg6: memref<2x!tpu.dma_semaphore, #tpu.memory_space<semaphore_mem>>) attributes {dimension_semantics = [#tpu.dimension_semantics<parallel>], iteration_bounds = array<i64: 2>, scalar_prefetch = 1 : i64, scratch_operands = 3 : i64, tpu.core_type = #tpu.core_type<tc>, window_params = [{}, {transform_indices = @transform_1, window_bounds = array<i64: 1, 1, 128>}]} {
    %c256_i32 = arith.constant 256 : i32
    %0 = arith.muli %arg0, %c256_i32 : i32
    %c128_i32 = arith.constant 128 : i32
    %1 = arith.muli %arg0, %c128_i32 : i32
    %c200_i32 = arith.constant 200 : i32
    %2 = arith.subi %c200_i32, %1 : i32
    %c128_i32_0 = arith.constant 128 : i32
    %3 = arith.minsi %c128_i32_0, %2 : i32
    %c0_i32 = arith.constant 0 : i32
    %c0_i32_1 = arith.constant 0 : i32
    %4 = arith.subi %3, %c0_i32_1 : i32
    %5 = arith.addi %c0_i32_1, %4 : i32
    %c1_i32 = arith.constant 1 : i32
    scf.for %arg7 = %c0_i32_1 to %5 step %c1_i32  : i32 {
      %19 = arith.addi %0, %arg7 : i32
      %20 = arith.index_cast %19 : i32 to index
      %21 = memref.load %arg1[%20] : memref<512xi32, #tpu.memory_space<smem>>
      %c128_i32_12 = arith.constant 128 : i32
      %22 = arith.addi %0, %c128_i32_12 : i32
      %23 = arith.addi %22, %arg7 : i32
      %24 = arith.index_cast %23 : i32 to index
      %25 = memref.load %arg1[%24] : memref<512xi32, #tpu.memory_space<smem>>
      %c0_i32_13 = arith.constant 0 : i32
      %c0_i32_14 = arith.constant 0 : i32
      %26 = tpu.memref_slice %arg2[%21, %c0_i32_14] : memref<16x32xf32, #tpu.memory_space<any>> -> memref<1x32xf32, #tpu.memory_space<any>>
      %c0_i32_15 = arith.constant 0 : i32
      %27 = tpu.memref_slice %arg4[%arg7, %c0_i32_15] : memref<128x32xf32, #tpu.memory_space<vmem>> -> memref<1x32xf32, #tpu.memory_space<vmem>>
      %28 = tpu.memref_slice %arg6[%c0_i32_13] : memref<2x!tpu.dma_semaphore, #tpu.memory_space<semaphore_mem>> -> memref<1x!tpu.dma_semaphore, #tpu.memory_space<semaphore_mem>>
      %29 = tpu.memref_squeeze %28 : memref<1x!tpu.dma_semaphore, #tpu.memory_space<semaphore_mem>> -> memref<!tpu.dma_semaphore, #tpu.memory_space<semaphore_mem>>
      tpu.enqueue_dma source(%26 : memref<1x32xf32, #tpu.memory_space<any>>) target(%27 : memref<1x32xf32, #tpu.memory_space<vmem>>) target_semaphore(%29 : memref<!tpu.dma_semaphore, #tpu.memory_space<semaphore_mem>>)
      %c1_i32_16 = arith.constant 1 : i32
      %c0_i32_17 = arith.constant 0 : i32
      %30 = tpu.memref_slice %arg2[%25, %c0_i32_17] : memref<16x32xf32, #tpu.memory_space<any>> -> memref<1x32xf32, #tpu.memory_space<any>>
      %c0_i32_18 = arith.constant 0 : i32
      %31 = tpu.memref_slice %arg5[%arg7, %c0_i32_18] : memref<128x32xf32, #tpu.memory_space<vmem>> -> memref<1x32xf32, #tpu.memory_space<vmem>>
      %32 = tpu.memref_slice %arg6[%c1_i32_16] : memref<2x!tpu.dma_semaphore, #tpu.memory_space<semaphore_mem>> -> memref<1x!tpu.dma_semaphore, #tpu.memory_space<semaphore_mem>>
      %33 = tpu.memref_squeeze %32 : memref<1x!tpu.dma_semaphore, #tpu.memory_space<semaphore_mem>> -> memref<!tpu.dma_semaphore, #tpu.memory_space<semaphore_mem>>
      tpu.enqueue_dma source(%30 : memref<1x32xf32, #tpu.memory_space<any>>) target(%31 : memref<1x32xf32, #tpu.memory_space<vmem>>) target_semaphore(%33 : memref<!tpu.dma_semaphore, #tpu.memory_space<semaphore_mem>>)
    }
    %c0_i32_2 = arith.constant 0 : i32
    %c0_i32_3 = arith.constant 0 : i32
    %6 = arith.subi %3, %c0_i32_3 : i32
    %7 = arith.addi %c0_i32_3, %6 : i32
    %c1_i32_4 = arith.constant 1 : i32
    scf.for %arg7 = %c0_i32_3 to %7 step %c1_i32_4  : i32 {
      %c0_i32_12 = arith.constant 0 : i32
      %c0_i32_13 = arith.constant 0 : i32
      %c0_i32_14 = arith.constant 0 : i32
      %19 = tpu.memref_slice %arg2[%c0_i32_13, %c0_i32_14] : memref<16x32xf32, #tpu.memory_space<any>> -> memref<1x32xf32, #tpu.memory_space<any>>
      %c0_i32_15 = arith.constant 0 : i32
      %c0_i32_16 = arith.constant 0 : i32
      %20 = tpu.memref_slice %arg4[%c0_i32_15, %c0_i32_16] : memref<128x32xf32, #tpu.memory_space<vmem>> -> memref<1x32xf32, #tpu.memory_space<vmem>>
      %21 = tpu.memref_slice %arg6[%c0_i32_12] : memref<2x!tpu.dma_semaphore, #tpu.memory_space<semaphore_mem>> -> memref<1x!tpu.dma_semaphore, #tpu.memory_space<semaphore_mem>>
      %22 = tpu.memref_squeeze %21 : memref<1x!tpu.dma_semaphore, #tpu.memory_space<semaphore_mem>> -> memref<!tpu.dma_semaphore, #tpu.memory_space<semaphore_mem>>
      tpu.wait_dma2 semaphore(%22 : memref<!tpu.dma_semaphore, #tpu.memory_space<semaphore_mem>>) src(%19 : memref<1x32xf32, #tpu.memory_space<any>>) dst(%20 : memref<1x32xf32, #tpu.memory_space<vmem>>)
      %c1_i32_17 = arith.constant 1 : i32
      %c0_i32_18 = arith.constant 0 : i32
      %c0_i32_19 = arith.constant 0 : i32
      %23 = tpu.memref_slice %arg2[%c0_i32_18, %c0_i32_19] : memref<16x32xf32, #tpu.memory_space<any>> -> memref<1x32xf32, #tpu.memory_space<any>>
      %c0_i32_20 = arith.constant 0 : i32
      %c0_i32_21 = arith.constant 0 : i32
      %24 = tpu.memref_slice %arg5[%c0_i32_20, %c0_i32_21] : memref<128x32xf32, #tpu.memory_space<vmem>> -> memref<1x32xf32, #tpu.memory_space<vmem>>
      %25 = tpu.memref_slice %arg6[%c1_i32_17] : memref<2x!tpu.dma_semaphore, #tpu.memory_space<semaphore_mem>> -> memref<1x!tpu.dma_semaphore, #tpu.memory_space<semaphore_mem>>
      %26 = tpu.memref_squeeze %25 : memref<1x!tpu.dma_semaphore, #tpu.memory_space<semaphore_mem>> -> memref<!tpu.dma_semaphore, #tpu.memory_space<semaphore_mem>>
      tpu.wait_dma2 semaphore(%26 : memref<!tpu.dma_semaphore, #tpu.memory_space<semaphore_mem>>) src(%23 : memref<1x32xf32, #tpu.memory_space<any>>) dst(%24 : memref<1x32xf32, #tpu.memory_space<vmem>>)
    }
    %c0 = arith.constant 0 : index
    %c0_5 = arith.constant 0 : index
    %8 = vector.load %arg4[%c0, %c0_5] : memref<128x32xf32, #tpu.memory_space<vmem>>, vector<128x32xf32>
    %c0_6 = arith.constant 0 : index
    %c0_7 = arith.constant 0 : index
    %9 = vector.load %arg5[%c0_6, %c0_7] : memref<128x32xf32, #tpu.memory_space<vmem>>, vector<128x32xf32>
    %10 = arith.mulf %8, %9 : vector<128x32xf32>
    %cst = arith.constant dense<0.000000e+00> : vector<128xf32>
    %11 = vector.multi_reduction <add>, %10, %cst [1] : vector<128x32xf32> to vector<128xf32>
    %12 = arith.negf %11 : vector<128xf32>
    %13 = math.exp %12 : vector<128xf32>
    %cst_8 = arith.constant 1.000000e+00 : f32
    %14 = vector.broadcast %cst_8 : f32 to vector<128xf32>
    %15 = arith.addf %14, %13 : vector<128xf32>
    %16 = arith.divf %14, %15 : vector<128xf32>
    %17 = vector.shape_cast %16 : vector<128xf32> to vector<1x1x128xf32>
    %c0_9 = arith.constant 0 : index
    %c0_10 = arith.constant 0 : index
    %c0_11 = arith.constant 0 : index
    %18 = vector.load %arg3[%c0_9, %c0_10, %c0_11] : memref<1x1x128xf32, #tpu.memory_space<vmem>>, vector<1x1x128xf32>
    tpu.vector_store %arg3[%c0_9, %c0_10, %c0_11], %17 {strides = array<i32>} : memref<1x1x128xf32, #tpu.memory_space<vmem>>, vector<1x1x128xf32>,
    return
  }
  func.func @transform_1(%arg0: i32, %arg1: memref<512xi32, #tpu.memory_space<smem>>) -> (i32, i32, i32) {
    %c0_i32 = arith.constant 0 : i32
    %c0_i32_0 = arith.constant 0 : i32
    %c0_i32_1 = arith.constant 0 : i32
    return %arg0, %c0_i32, %c0_i32_0 : i32, i32, i32
  }
}

</mosaic_0001>

<bundles_post_ra>
// kernel: label_agree_pred.1
= control target key start
LH: loop header
LB: loop body
LE: loop exit
PB: predicated region body
PF: predicated region fallthrough
CT: control target
= control target key end

     0   :  { %s1014_s0 = inlined_call_operand.vmem [shape: s32[512], index: 0, kind: input, shape index: {}]   ;;  %s1015_s1 = inlined_call_operand.vmem [shape: f32[16,32], index: 1, kind: input, shape index: {}]   ;;  %s1016_s2 = inlined_call_operand.hbm [shape: f32[2,1,128], index: 2, kind: output, shape index: {}]  }
   0x1   :  { %s7_s11 = sshll.u32 %s1014_s0, 4  ;;  %s8_s11 = int_to_ptr.vmem [resolvable:$true] %s7_s11 }
   0x2   :  { %s745_s12 = scalar_lea.vmem %s8_s11, 64  ;;  %p750_p1 = scmp.lt.s32.totalorder %s8_s11, %s8_s11 }
   0x3   :  { %p746_p0 = scmp.ne.s32.totalorder %s8_s11, %s745_s12  ;;  %p751_p2 = scmp.lt.s32.totalorder %s745_s12, %s745_s12 }
   0x5   :  { %p752_p3 = por %p751_p2, %p750_p1 }
   0x7   :  { %p753_p4 = pnand %p752_p3, %p746_p0 }
   0x9   :  { %756 = shalt.err (!%p753_p4)  }
   0xa   :  { %s833_s13 = smov [#allocation6]  }
   0xb   :  { %10 = dma.vmem_to_smem %s8_s11, 64, %s833_s13, [#allocation5] }
   0xc   :  { %803 = dma.done.wait [#allocation5], 64 }
   0xd   :  { %804 = vsyncadd [#allocation5], 4294967232 }
   0xe   :  { %12 = sfence }
   0xf   :  { %13 = vsyncpa [#allocation8], 0 }
  0x10   :  { %15 = vsyncpa [#allocation8 + $0x1], 0  ;;  %s853_s14 = smov 0   ;;  %s855_s15 = smov 0  }
  0x11   :  { %s857_s0 = smov 0  }
  0x12 LB: > { %s599_s16 = sadd.s32 4294967295, %s823_s0   ;;  %s870_s17 = sadd.s32 1, %s823_s0   ;;  %s823_s0 = sphi %s857_s0, %s1021_s0   ;;  %s819_s15 = sphi %s855_s15, %s1020_s15   ;;  %s815_s14 = sphi %s853_s14, %s1019_s14  }
  0x13   : > { %s24_s18 = ssub.s32 %s823_s0, %s870_s17  ;;  %s27_s19 = sadd.s32 1, %s819_s15 }
  0x14   : > { %p25_p5 = scmp.eq.s32.totalorder %s24_s18, 0  ;;  %p600_p6 = scmp.ne.s32.totalorder %s24_s18, 0 }
  0x15   : > { %p31_p7 = scmp.eq.s32.totalorder %s823_s0, 1  ;;  %p36_p8 = scmp.ne.s32.totalorder %s819_s15, %s815_s14 }
  0x16   : > { %s879_s20 = scalar_select %p25_p5, %s819_s15, %s27_s19  }
  0x17   : > { %p881_p9 = por %p600_p6, %p31_p7  ;;  %p37_p10 = scmp.eq.s32.totalorder %s599_s16, 1 }
  0x18   : > { %p601_p12 = scmp.ge.s32.totalorder %s823_s0, 2 }
  0x19   : > { %p885_p11 = por %p37_p10, %p36_p8  ;;  %s51_s23 = sand.u32 (!%p601_p12), 1, %s819_s15  }
  0x1a   : > { %46 = sbr.rel (%p601_p12) target bundleno = 297 (0x129), region = 12  ;;  %s602_s24 = sshll.u32 (!%p601_p12), %s823_s0, 8 }
  0x1b   : > { %s603_s25 = sshll.u32 (!%p601_p12), %s823_s0, 7  ;;  %s901_s28 = scalar_lea.vmem (!%p601_p12), [#allocation7], %s51_s23 }
  0x1c   : > { %s893_s26 = ssub.s32 (!%p601_p12), 200, %s603_s25 }
  0x1d   : > { %p56_p13 = scmp.lt.s32.totalorder (!%p601_p12), %s893_s26, 128  ;;  %p627_p0 = scmp.le.s32.totalorder (!%p601_p12), %s893_s26, 0 }
  0x1f   : > { %s897_s27 = scalar_select %p56_p13, %s893_s26, 128 }
  0x20   : > { %580 = sbr.rel (%p627_p0) target bundleno = 58 (0x3a), region = 139  ;;  %s825_s29 = smov (!%p627_p0), 0  }
  0x25 LB: >> { %s66_s30 = sadd.s32 128, %s602_s24  ;;  %s64_s3 = sadd.s32 %s827_s29, %s602_s24  ;;  %s827_s29 = sphi %s825_s29, %s61_s29  }
  0x26   : >> { %s67_s4 = sadd.s32 %s827_s29, %s66_s30  ;;  %s65_s5 = sld [smem:[#allocation6 + %s64_s3]] }
  0x27   : >> { %s68_s6 = sld [smem:[#allocation6 + %s67_s4]]  ;;  %s70_s10 = scalar_lea.vmem [#allocation2], %s827_s29 }
  0x2c   : >> { %s69_s9 = scalar_lea.vmem %s1015_s1, %s65_s5 }
  0x2d   : >> { %v89_v0 = vld [vmem:[%s69_s9] sm:$0x1] }
  0x2e   : >> { %90 = vst [vmem:[%s70_s10] sm:$0x1] %v89_v0 }
  0x2f   : >> { %116 = vsyncadd [#allocation4], 16  ;;  %s117_s13 = scalar_lea.vmem %s1015_s1, %s68_s6  ;;  %s118_s16 = scalar_lea.vmem [#allocation3], %s827_s29 }
  0x30   : >> { %v138_v1 = vld [vmem:[%s117_s13] sm:$0x1] }
  0x31   : >> { %139 = vst [vmem:[%s118_s16] sm:$0x1] %v138_v1 }
  0x32   : >> { %165 = vsyncadd [#allocation4 + $0x1], 16  ;;  %s61_s29 = sadd.s32 1, %s827_s29  }
  0x33   : >> { %p60_p1 = scmp.ge.s32.totalorder %s61_s29, %s897_s27 }
  0x35   : > { %63 = sbr.rel (!%p60_p1) target bundleno = 37 (0x25), region = 145 }
  0x3a PF: > { %585 = sbr.rel (%p627_p0) target bundleno = 74 (0x4a), region = 150  ;;  %s829_s18 = smov (!%p627_p0), 0  }
  0x3f LB: >> { %805 = dma.done.wait [#allocation4], 16  ;;  %s831_s18 = sphi %s829_s18, %s169_s18  }
  0x40   : >> { %806 = vsyncadd [#allocation4], 4294967280 }
  0x41   : >> { %807 = dma.done.wait [#allocation4 + $0x1], 16 }
  0x42   : >> { %808 = vsyncadd [#allocation4 + $0x1], 4294967280  ;;  %s169_s18 = sadd.s32 1, %s831_s18  }
  0x43   : >> { %p168_p2 = scmp.ge.s32.totalorder %s169_s18, %s897_s27 }
  0x45   : > { %171 = sbr.rel (!%p168_p2) target bundleno = 63 (0x3f), region = 156 }
  0x4a PF: > { %vm226_vm0 = vcmask 261120   ;;  %vm398_vm1 = vcmask 130112   ;;  %vm405_vm2 = vcmask 195712   ;;  %vm412_vm3 = vcmask 261312   ;;  %s622_s19 = sshll.u32 %s823_s0, 4  ;;  %s513_s24 = sshll.u32 %s901_s28, 4  ;;  %s514_s24 = int_to_ptr.vmem [resolvable:$true] %s513_s24 }
  0x4b   : > { %v178_v2 = vld [vmem:[#allocation2] sm:$0xff]  ;;  %v180_v4 = vld [vmem:[#allocation2 + $0x10] sm:$0xff]  ;;  %v179_v7 = vld [vmem:[#allocation2 + $0x8] sm:$0xff]  ;;  %vm419_vm4 = vcmask 326912   ;;  %vm426_vm5 = vcmask 392512   ;;  %vm433_vm6 = vcmask 458112   ;;  %s979_s27 = scalar_lea.hbm %s1016_s2, %s622_s19 }
  0x4c   : > { %v194_v3 = vld [vmem:[#allocation3] sm:$0xff]  ;;  %v196_v6 = vld [vmem:[#allocation3 + $0x10] sm:$0xff]  ;;  %v195_v8 = vld [vmem:[#allocation3 + $0x8] sm:$0xff]  ;;  %vm440_vm7 = vcmask 523712   ;;  %vm447_vm8 = vcmask 589312   ;;  %vm454_vm9 = vcmask 654912  }
  0x4d   : > { %v210_v5 = vmul.f32 %v194_v3, %v178_v2  ;;  %v212_v9 = vmul.f32 %v196_v6, %v180_v4  ;;  %v211_v10 = vmul.f32 %v195_v8, %v179_v7  ;;  %v181_v11 = vld [vmem:[#allocation2 + $0x18] sm:$0xff]  ;;  %v182_v13 = vld [vmem:[#allocation2 + $0x20] sm:$0xff]  ;;  %v183_v17 = vld [vmem:[#allocation2 + $0x28] sm:$0xff]  ;;  %vm461_vm10 = vcmask 720512   ;;  %s501_s29 = scalar_lea.sflag [#allocation8], %s51_s23  ;;  %s757_s30 = scalar_lea.vmem %s514_s24, 16 }
  0x4e   : > { %v197_v12 = vld [vmem:[#allocation3 + $0x18] sm:$0xff]  ;;  %v198_v16 = vld [vmem:[#allocation3 + $0x20] sm:$0xff]  ;;  %v199_v18 = vld [vmem:[#allocation3 + $0x28] sm:$0xff]  ;;  %vm468_vm11 = vcmask 786112   ;;  %vm475_vm12 = vcmask 851712   ;;  %vm482_vm13 = vcmask 917312   ;;  %p758_p3 = scmp.ne.s32.totalorder %s514_s24, %s757_s30 }
  0x4f   : > { %v227_v14 = vsel %vm226_vm0, %v210_v5, 0.0  ;;  %v213_v15 = vmul.f32 %v197_v12, %v181_v11  ;;  %v233_v19 = vsel %vm226_vm0, %v212_v9, 0.0  ;;  %v230_v20 = vsel %vm226_vm0, %v211_v10, 0.0  ;;  %v184_v24 = vld [vmem:[#allocation2 + $0x30] sm:$0xff]  ;;  %v185_v26 = vld [vmem:[#allocation2 + $0x38] sm:$0xff]  ;;  %v186_v32 = vld [vmem:[#allocation2 + $0x40] sm:$0xff] }
  0x50   : > { %228 = vadd.xlane.f32.xlu0 %v227_v14  ;;  %234 = vadd.xlane.f32.xlu1 %v233_v19  ;;  %v214_v21 = vmul.f32 %v198_v16, %v182_v13  ;;  %v215_v23 = vmul.f32 %v199_v18, %v183_v17  ;;  %v200_v25 = vld [vmem:[#allocation3 + $0x30] sm:$0xff]  ;;  %v201_v27 = vld [vmem:[#allocation3 + $0x38] sm:$0xff]  ;;  %v202_v33 = vld [vmem:[#allocation3 + $0x40] sm:$0xff]  ;;  %vm489_vm14 = vcmask 982912   ;;  %vm496_vm15 = vcmask 1048512   ;;  %p759_p4 = pnand %p758_p3, %p881_p9  ;;  %s834_s3 = smov [#allocation7]  }
  0x51   : > { %v236_v22 = vsel %vm226_vm0, %v213_v15, 0.0  ;;  %v216_v29 = vmul.f32 %v200_v25, %v184_v24  ;;  %v217_v31 = vmul.f32 %v201_v27, %v185_v26  ;;  %v187_v34 = vld [vmem:[#allocation2 + $0x48] sm:$0xff]  ;;  %v218_v37 = vmul.f32 %v202_v33, %v186_v32  ;;  %v188_v40 = vld [vmem:[#allocation2 + $0x50] sm:$0xff]  ;;  %v189_v42 = vld [vmem:[#allocation2 + $0x58] sm:$0xff]  ;;  %s761_s4 = sshll.u32 %s834_s3, 4  ;;  %s762_s4 = int_to_ptr.vmem [resolvable:$false] %s761_s4 }
  0x52   : > { %v239_v28 = vsel %vm226_vm0, %v214_v21, 0.0  ;;  %v242_v30 = vsel %vm226_vm0, %v215_v23, 0.0  ;;  %v203_v35 = vld [vmem:[#allocation3 + $0x48] sm:$0xff]  ;;  %v204_v41 = vld [vmem:[#allocation3 + $0x50] sm:$0xff]  ;;  %v205_v43 = vld [vmem:[#allocation3 + $0x58] sm:$0xff]  ;;  %v387_v27 = vlaneseq  ;;  %p760_p5 = pneg %p759_p4  ;;  %s763_s5 = scalar_lea.vmem %s762_s4, 32 }
  0x53   : > { %v245_v36 = vsel %vm226_vm0, %v216_v29, 0.0  ;;  %v248_v38 = vsel %vm226_vm0, %v217_v31, 0.0  ;;  %v219_v39 = vmul.f32 %v203_v35, %v187_v34  ;;  %v251_v44 = vsel %vm226_vm0, %v218_v37, 0.0  ;;  %v190_v48 = vld [vmem:[#allocation2 + $0x60] sm:$0xff]  ;;  %v191_v50 = vld [vmem:[#allocation2 + $0x68] sm:$0xff]  ;;  %v192_v56 = vld [vmem:[#allocation2 + $0x70] sm:$0xff]  ;;  %p764_p6 = scmp.lt.s32.totalorder %s514_s24, %s762_s4  ;;  %p765_p7 = scmp.lt.s32.totalorder %s763_s5, %s757_s30 }
  0x54   : > { %231 = vadd.xlane.f32.xlu0 %v230_v20  ;;  %237 = vadd.xlane.f32.xlu1 %v236_v22  ;;  %v220_v45 = vmul.f32 %v204_v41, %v188_v40  ;;  %v221_v47 = vmul.f32 %v205_v43, %v189_v42  ;;  %v206_v49 = vld [vmem:[#allocation3 + $0x60] sm:$0xff]  ;;  %v207_v51 = vld [vmem:[#allocation3 + $0x68] sm:$0xff]  ;;  %v208_v57 = vld [vmem:[#allocation3 + $0x70] sm:$0xff] }
  0x55   : > { %v254_v46 = vsel %vm226_vm0, %v219_v39, 0.0  ;;  %v222_v53 = vmul.f32 %v206_v49, %v190_v48  ;;  %v223_v55 = vmul.f32 %v207_v51, %v191_v50  ;;  %v193_v58 = vld [vmem:[#allocation2 + $0x78] sm:$0xff]  ;;  %v224_v61 = vmul.f32 %v208_v57, %v192_v56  ;;  %p766_p8 = por %p765_p7, %p764_p6 }
  0x56   : > { %v257_v52 = vsel %vm226_vm0, %v220_v45, 0.0  ;;  %v260_v54 = vsel %vm226_vm0, %v221_v47, 0.0  ;;  %v209_v59 = vld [vmem:[#allocation3 + $0x78] sm:$0xff]  ;;  %v938_v45 = vshrl.u32 %v387_v27, 7 }
  0x57   : > { %v263_v60 = vsel %vm226_vm0, %v222_v53, 0.0  ;;  %v266_v62 = vsel %vm226_vm0, %v223_v55, 0.0  ;;  %v225_v63 = vmul.f32 %v209_v59, %v193_v58  ;;  %v269_v0 = vsel %vm226_vm0, %v224_v61, 0.0  ;;  %p767_p10 = pnand %p766_p8, %p760_p5 }
  0x58   : > { %240 = vadd.xlane.f32.xlu0 %v239_v28  ;;  %243 = vadd.xlane.f32.xlu1 %v242_v30 }
  0x59   : > { %v272_v1 = vsel %vm226_vm0, %v225_v63, 0.0 }
  0x5c   : > { %246 = vadd.xlane.f32.xlu0 %v245_v36  ;;  %249 = vadd.xlane.f32.xlu1 %v248_v38  ;;  %v936_v36 = vand.u32 127, %v387_v27 }
  0x5e   : > { %v393_v49 = vadd.s32 4294967288, %v936_v36  ;;  %v407_v53 = vadd.s32 4294967272, %v936_v36  ;;  %v414_v57 = vadd.s32 4294967264, %v936_v36  ;;  %v391_v59 = vsub.s32 %v936_v36, %v938_v45 }
  0x5f   : > { %v442_v27 = vadd.s32 4294967232, %v936_v36 }
  0x60   : > { %252 = vadd.xlane.f32.xlu0 %v251_v44  ;;  %255 = vadd.xlane.f32.xlu1 %v254_v46  ;;  %v400_v46 = vadd.s32 4294967280, %v936_v36  ;;  %v410_v63 = vsub.s32 %v407_v53, %v938_v45 }
  0x64   : > { %258 = vadd.xlane.f32.xlu0 %v257_v52  ;;  %261 = vadd.xlane.f32.xlu1 %v260_v54 }
  0x68   : > { %264 = vadd.xlane.f32.xlu0 %v263_v60  ;;  %267 = vadd.xlane.f32.xlu1 %v266_v62  ;;  %v396_v60 = vsub.s32 %v393_v49, %v938_v45  ;;  %v403_v62 = vsub.s32 %v400_v46, %v938_v45 }
  0x6c   : > { %270 = vadd.xlane.f32.xlu0 %v269_v0  ;;  %273 = vadd.xlane.f32.xlu1 %v272_v1 }
  0xd9   : > { %v229_v2 = vpop.xlane.xlu0 %228  ;;  %v235_v4 = vpop.xlane.xlu1 %234 }
  0xda   : > { %v606_v3 = vmul.f32 -1.442695, %v229_v2  ;;  %v608_v5 = vmul.f32 -1.442695, %v235_v4  ;;  %v421_v4 = vadd.s32 4294967256, %v936_v36 }
  0xdc   : > { %681 = vpow2.f32 %v606_v3  ;;  %v417_v3 = vsub.s32 %v414_v57, %v938_v45 }
  0xdd   : > { %683 = vpow2.f32 %v608_v5  ;;  %v232_v6 = vpop.xlane.xlu0 %231  ;;  %v238_v8 = vpop.xlane.xlu1 %237 }
  0xde   : > { %v607_v7 = vmul.f32 -1.442695, %v232_v6  ;;  %v609_v9 = vmul.f32 -1.442695, %v238_v8 }
  0xe0   : > { %685 = vpow2.f32 %v607_v7 }
  0xe1   : > { %687 = vpow2.f32 %v609_v9  ;;  %v241_v10 = vpop.xlane.xlu0 %240  ;;  %v244_v12 = vpop.xlane.xlu1 %243  ;;  %v428_v9 = vadd.s32 4294967248, %v936_v36 }
  0xe2   : > { %v610_v11 = vmul.f32 -1.442695, %v241_v10  ;;  %v611_v13 = vmul.f32 -1.442695, %v244_v12 }
  0xe4   : > { %689 = vpow2.f32 %v610_v11 }
  0xe5   : > { %691 = vpow2.f32 %v611_v13  ;;  %v247_v14 = vpop.xlane.xlu0 %246  ;;  %v250_v16 = vpop.xlane.xlu1 %249 }
  0xe6   : > { %v612_v15 = vmul.f32 -1.442695, %v247_v14  ;;  %v613_v17 = vmul.f32 -1.442695, %v250_v16 }
  0xe8   : > { %693 = vpow2.f32 %v612_v15 }
  0xe9   : > { %v682_v18 = vpop.eup %681  ;;  %695 = vpow2.f32 %v613_v17  ;;  %v253_v19 = vpop.xlane.xlu0 %252 }
  0xea   : > { %v684_v20 = vpop.eup %683  ;;  %v323_v21 = vadd.f32 1.0, %v682_v18  ;;  %v614_v22 = vmul.f32 -1.442695, %v253_v19  ;;  %v256_v23 = vpop.xlane.xlu1 %255  ;;  %v424_v18 = vsub.s32 %v421_v4, %v938_v45  ;;  %v435_v19 = vadd.s32 4294967240, %v936_v36 }
  0xeb   : > { %v325_v24 = vadd.f32 1.0, %v684_v20  ;;  %v615_v25 = vmul.f32 -1.442695, %v256_v23  ;;  %v431_v23 = vsub.s32 %v428_v9, %v938_v45  ;;  %v491_v4 = vadd.s32 4294967176, %v936_v36 }
  0xec   : > { %697 = vrcp.f32 %v323_v21 }
  0xed   : > { %v686_v26 = vpop.eup %685  ;;  %699 = vrcp.f32 %v325_v24  ;;  %v259_v28 = vpop.xlane.xlu0 %258 }
  0xee   : > { %v688_v29 = vpop.eup %687  ;;  %v324_v30 = vadd.f32 1.0, %v686_v26  ;;  %701 = vpow2.f32 %v614_v22  ;;  %v616_v31 = vmul.f32 -1.442695, %v259_v28  ;;  %v262_v32 = vpop.xlane.xlu1 %261  ;;  %v449_v28 = vadd.s32 4294967224, %v936_v36 }
  0xef   : > { %v326_v33 = vadd.f32 1.0, %v688_v29  ;;  %703 = vpow2.f32 %v615_v25  ;;  %v617_v34 = vmul.f32 -1.442695, %v262_v32  ;;  %v438_v32 = vsub.s32 %v435_v19, %v938_v45 }
  0xf0   : > { %705 = vrcp.f32 %v324_v30 }
  0xf1   : > { %v690_v35 = vpop.eup %689  ;;  %707 = vrcp.f32 %v326_v33  ;;  %v265_v37 = vpop.xlane.xlu0 %264 }
  0xf2   : > { %v692_v38 = vpop.eup %691  ;;  %v327_v39 = vadd.f32 1.0, %v690_v35  ;;  %709 = vpow2.f32 %v616_v31  ;;  %v618_v40 = vmul.f32 -1.442695, %v265_v37  ;;  %v268_v41 = vpop.xlane.xlu1 %267 }
  0xf3   : > { %v328_v42 = vadd.f32 1.0, %v692_v38  ;;  %711 = vpow2.f32 %v617_v34  ;;  %v619_v43 = vmul.f32 -1.442695, %v268_v41  ;;  %v452_v41 = vsub.s32 %v449_v28, %v938_v45 }
  0xf4   : > { %713 = vrcp.f32 %v327_v39 }
  0xf5   : > { %v694_v44 = vpop.eup %693  ;;  %715 = vrcp.f32 %v328_v42  ;;  %v271_v47 = vpop.xlane.xlu0 %270  ;;  %v456_v42 = vadd.s32 4294967216, %v936_v36 }
  0xf6   : > { %v696_v48 = vpop.eup %695  ;;  %v329_v50 = vadd.f32 1.0, %v694_v44  ;;  %717 = vpow2.f32 %v618_v40  ;;  %v620_v51 = vmul.f32 -1.442695, %v271_v47  ;;  %v274_v52 = vpop.xlane.xlu1 %273  ;;  %v445_v40 = vsub.s32 %v442_v27, %v938_v45 }
  0xf7   : > { %v330_v54 = vadd.f32 1.0, %v696_v48  ;;  %719 = vpow2.f32 %v619_v43  ;;  %v621_v55 = vmul.f32 -1.442695, %v274_v52  ;;  %v463_v48 = vadd.s32 4294967208, %v936_v36 }
  0xf8   : > { %721 = vrcp.f32 %v329_v50  ;;  %v459_v53 = vsub.s32 %v456_v42, %v938_v45 }
  0xf9   : > { %v698_v56 = vpop.eup %697  ;;  %723 = vrcp.f32 %v330_v54  ;;  %v470_v54 = vadd.s32 4294967200, %v936_v36  ;;  %v466_v57 = vsub.s32 %v463_v48, %v938_v45 }
  0xfa   : > { %v700_v58 = vpop.eup %699  ;;  %725 = vpow2.f32 %v620_v51  ;;  %v392_v7 = vrot.slane %v698_v56, %v391_v59 }
  0xfb   : > { %v702_v61 = vpop.eup %701  ;;  %727 = vpow2.f32 %v621_v55  ;;  %v404_v11 = vrot.slane %v700_v58, %v403_v62  ;;  %v477_v58 = vadd.s32 4294967192, %v936_v36 }
  0xfc   : > { %v704_v0 = vpop.eup %703  ;;  %v331_v1 = vadd.f32 1.0, %v702_v61 }
  0xfd   : > { %v706_v2 = vpop.eup %705  ;;  %v332_v5 = vadd.f32 1.0, %v704_v0  ;;  %v484_v0 = vadd.s32 4294967184, %v936_v36 }
  0xfe   : > { %v708_v6 = vpop.eup %707  ;;  %v397_v8 = vrot.slane %v706_v2, %v396_v60  ;;  %729 = vrcp.f32 %v331_v1 }
  0xff   : > { %v710_v10 = vpop.eup %709  ;;  %v411_v12 = vrot.slane %v708_v6, %v410_v63  ;;  %731 = vrcp.f32 %v332_v5  ;;  %v473_v63 = vsub.s32 %v470_v54, %v938_v45  ;;  %v487_v9 = vsub.s32 %v484_v0, %v938_v45 }
 0x100   : > { %v712_v13 = vpop.eup %711  ;;  %v399_v14 = vsel %vm398_vm1, %v397_v8, %v392_v7  ;;  %v333_v15 = vadd.f32 1.0, %v710_v10 }
 0x101   : > { %v714_v16 = vpop.eup %713  ;;  %v406_v17 = vsel %vm405_vm2, %v404_v11, %v399_v14  ;;  %v334_v20 = vadd.f32 1.0, %v712_v13 }
 0x102   : > { %v716_v21 = vpop.eup %715  ;;  %v418_v22 = vrot.slane %v714_v16, %v417_v3  ;;  %733 = vrcp.f32 %v333_v15  ;;  %v413_v25 = vsel %vm412_vm3, %v411_v12, %v406_v17  ;;  %v480_v3 = vsub.s32 %v477_v58, %v938_v45 }
 0x103   : > { %v718_v24 = vpop.eup %717  ;;  %735 = vrcp.f32 %v334_v20  ;;  %v425_v31 = vrot.slane %v716_v21, %v424_v18  ;;  %v494_v12 = vsub.s32 %v491_v4, %v938_v45 }
 0x104   : > { %v720_v26 = vpop.eup %719  ;;  %v335_v29 = vadd.f32 1.0, %v718_v24  ;;  %v420_v35 = vsel %vm419_vm4, %v418_v22, %v413_v25 }
 0x105   : > { %v722_v30 = vpop.eup %721  ;;  %v336_v33 = vadd.f32 1.0, %v720_v26  ;;  %v427_v44 = vsel %vm426_vm5, %v425_v31, %v420_v35 }
 0x106   : > { %v724_v34 = vpop.eup %723  ;;  %v432_v37 = vrot.slane %v722_v30, %v431_v23  ;;  %737 = vrcp.f32 %v335_v29 }
 0x107   : > { %v726_v38 = vpop.eup %725  ;;  %739 = vrcp.f32 %v336_v33  ;;  %v439_v46 = vrot.slane %v724_v34, %v438_v32 }
 0x108   : > { %v728_v39 = vpop.eup %727  ;;  %v337_v43 = vadd.f32 1.0, %v726_v38  ;;  %v434_v49 = vsel %vm433_vm6, %v432_v37, %v427_v44 }
 0x109   : > { %v338_v47 = vadd.f32 1.0, %v728_v39  ;;  %v441_v56 = vsel %vm440_vm7, %v439_v46, %v434_v49 }
 0x10a   : > { %741 = vrcp.f32 %v337_v43 }
 0x10b   : > { %v730_v50 = vpop.eup %729  ;;  %743 = vrcp.f32 %v338_v47 }
 0x10c   : > { %v732_v51 = vpop.eup %731  ;;  %v446_v52 = vrot.slane %v730_v50, %v445_v40 }
 0x10d   : > { %v453_v55 = vrot.slane %v732_v51, %v452_v41 }
 0x10e   : > { %v448_v59 = vsel %vm447_vm8, %v446_v52, %v441_v56 }
 0x10f   : > { %v734_v60 = vpop.eup %733  ;;  %v455_v1 = vsel %vm454_vm9, %v453_v55, %v448_v59 }
 0x110   : > { %v736_v61 = vpop.eup %735  ;;  %v460_v62 = vrot.slane %v734_v60, %v459_v53 }
 0x111   : > { %v467_v2 = vrot.slane %v736_v61, %v466_v57 }
 0x112   : > { %v462_v5 = vsel %vm461_vm10, %v460_v62, %v455_v1 }
 0x113   : > { %v738_v6 = vpop.eup %737  ;;  %v469_v10 = vsel %vm468_vm11, %v467_v2, %v462_v5 }
 0x114   : > { %v740_v7 = vpop.eup %739  ;;  %v474_v8 = vrot.slane %v738_v6, %v473_v63 }
 0x115   : > { %v481_v11 = vrot.slane %v740_v7, %v480_v3 }
 0x116   : > { %v476_v13 = vsel %vm475_vm12, %v474_v8, %v469_v10 }
 0x117   : > { %v742_v14 = vpop.eup %741  ;;  %v483_v16 = vsel %vm482_vm13, %v481_v11, %v476_v13 }
 0x118   : > { %v744_v36 = vpop.eup %743  ;;  %v488_v15 = vrot.slane %v742_v14, %v487_v9 }
 0x119   : > { %v495_v17 = vrot.slane %v744_v36, %v494_v12 }
 0x11a   : > { %v490_v18 = vsel %vm489_vm14, %v488_v15, %v483_v16 }
 0x11b   : > { %v497_v45 = vsel %vm496_vm15, %v495_v17, %v490_v18 }
 0x11c   : > { %499 = vst [vmem:[%s901_s28] sm:$0x1] %v497_v45 }
 0x11d   : > { %770 = shalt.err (!%p767_p10)
}
 0x11e   : > { %s771_s28 = scalar_lea.hbm %s979_s27, 16  ;;  %s775_s7 = scalar_lea.hbm %s1016_s2, 32 }
 0x11f   : > { %p772_p12 = scmp.ne.s32.totalorder %s979_s27, %s771_s28  ;;  %p776_p1 = scmp.lt.s32.totalorder %s979_s27, %s1016_s2 }
 0x120   : > { %p777_p2 = scmp.lt.s32.totalorder %s775_s7, %s771_s28 }
 0x121   : > { %p773_p13 = pnand %p772_p12, %p881_p9 }
 0x122   : > { %p778_p3 = por %p777_p2, %p776_p1 }
 0x123   : > { %p774_p0 = pneg %p773_p13 }
 0x125   : > { %p779_p4 = pnand %p778_p3, %p774_p0 }
 0x127   : > { %782 = shalt.err (!%p779_p4)
}
 0x128   : > { %633 = dma.vmem_to_hbm [thread:$0]  (%p881_p9), %s514_s24, 16, %s979_s27, %s501_s29  }
 0x129 PF: > { %p639_p5 = scmp.ge.s32.totalorder %s823_s0, 1  ;;  %s525_s10 = sand.u32 1, %s815_s14  }
 0x12a   : > { %s526_s11 = scalar_lea.sflag [#allocation8], %s525_s10 }
 0x12b   : > { %p636_p6 = pnand %p639_p5, %p885_p11 }
 0x12d   : > { %p637_p7 = pneg %p636_p6 }
 0x12f   : > { %810 = dma.done.wait (%p637_p7), %s526_s11, 16  }
 0x130   : > { %812 = vsyncadd (%p637_p7), %s526_s11, 4294967280  ;;  %p18_p8 = scmp.ge.s32.totalorder %s870_s17, 3   ;;  %s1019_s14 = smov %s819_s15 }
 0x131   : > { %s1020_s15 = smov %s879_s20  ;;  %s1021_s0 = smov %s870_s17 }
 0x132   :  { %20 = sbr.rel (!%p18_p8) target bundleno = 18 (0x12), region = 167 }
 0x137   :  { %530 = vsyncpa [#allocation8], 1 }
 0x138   :  { %532 = vsyncpa [#allocation8 + $0x1], 1 }
 0x139   :  { %533 = vsyncmov [#allocation4] }
 0x13c   :  { %s534_s0 = vpop.sfrf %533 }
 0x13d   :  { %p625_p9 = scmp.ne.s32.totalorder %s534_s0, 0 }
 0x13f   :  { %538 = shalt.err (%p625_p9)  }
 0x140   :  { %540 = vsyncmov [#allocation4 + $0x1] }
 0x143   :  { %s541_s21 = vpop.sfrf %540 }
 0x144   :  { %p626_p11 = scmp.ne.s32.totalorder %s541_s21, 0 }
 0x146   :  { %545 = shalt.err (%p626_p11)  }

</bundles_post_ra>
